<compile_context>
chip_gen: v5e
topology: v5e:2x2
jax: 0.10.0
libtpu: 0.0.40
codegen_flags: <defaults>
</compile_context>

<pallas_src>
import functools

import jax
import jax.numpy as jnp
from jax.experimental import pallas as pl
from jax.experimental.pallas import tpu as pltpu

EPS = 1e-5
FUSED_MAX_B = 8192          # whole-batch-resident fast path threshold
DEFAULT_TILE_B = 4096       # streaming-path batch tile (fits every generation)
VMEM_LIMIT = 48 << 20       # scoped VMEM request; safe on v7x's 64 MiB physical


def _round_up(x, m):
    return ((x + m - 1) // m) * m


def _bn_scale_shift(stats, gamma_beta, inv_n):
    """stats: (1, 2F) = [sum | sum_sq] over the real batch; gamma_beta: (2, F)."""
    f = gamma_beta.shape[1]
    mean = stats[:, :f] * inv_n
    var = stats[:, f:] * inv_n - mean * mean          # biased variance (train fwd)
    scale = gamma_beta[0:1, :] * jax.lax.rsqrt(var + EPS)
    shift = gamma_beta[1:2, :] - mean * scale
    return scale, shift


# ----------------------------------------------------------------------------
# Fast path: whole batch resident in VMEM, single invocation.
# ----------------------------------------------------------------------------
def _mlp_fused_kernel(x_ref, w1_ref, w2_ref, w3_ref, bn1_ref, bn2_ref, b3_ref,
                      o_ref, *, inv_n):
    x = x_ref[...]                                      # (B, 20) f32
    ones_row = jnp.ones((1, x.shape[0]), jnp.float32)   # MXU-based batch reduction

    # Layer 1 (bias dropped: cancelled by the BN mean subtraction).
    h1 = jnp.dot(x, w1_ref[...], preferred_element_type=jnp.float32)
    st1 = jnp.dot(ones_row, jnp.concatenate([h1, h1 * h1], axis=1),
                  preferred_element_type=jnp.float32)   # (1, 2*100)
    s1, sh1 = _bn_scale_shift(st1, bn1_ref[...], inv_n)
    a1 = jnp.maximum(h1 * s1 + sh1, 0.0)

    # Layer 2 (bias dropped for the same reason).
    h2 = jnp.dot(a1, w2_ref[...], preferred_element_type=jnp.float32)
    st2 = jnp.dot(ones_row, jnp.concatenate([h2, h2 * h2], axis=1),
                  preferred_element_type=jnp.float32)   # (1, 2*50)
    s2, sh2 = _bn_scale_shift(st2, bn2_ref[...], inv_n)
    a2 = jnp.maximum(h2 * s2 + sh2, 0.0)

    # Layer 3 (unpadded: 4 output lanes).
    out = jnp.dot(a2, w3_ref[...], preferred_element_type=jnp.float32)
    o_ref[...] = (out + b3_ref[...]).astype(o_ref.dtype)


# ----------------------------------------------------------------------------
# Streaming path: 3-stage schedule over batch tiles, full-batch BN statistics.
# ----------------------------------------------------------------------------
def _mlp_streaming_kernel(x_ref, w1_ref, w2_ref, w3_ref, bn1_ref, bn2_ref, b3_ref,
                          o_ref, stats1_ref, stats2_ref, ss1_ref, ss2_ref,
                          *, inv_n, n_valid, tile_b):
    stage = pl.program_id(0)   # 0: stats of h1, 1: stats of h2, 2: emit output
    tile = pl.program_id(1)

    @pl.when(jnp.logical_and(stage == 0, tile == 0))
    def _init():
        stats1_ref[...] = jnp.zeros_like(stats1_ref)
        stats2_ref[...] = jnp.zeros_like(stats2_ref)

    x = x_ref[...]                                      # (TB, 20) f32

    # Valid-row mask folded into the MXU batch-reduction row (handles the
    # zero-padding of non-tile-multiple batches exactly).
    row_ids = tile * tile_b + jax.lax.broadcasted_iota(jnp.int32, (1, tile_b), 1)
    vrow = (row_ids < n_valid).astype(jnp.float32)      # (1, TB)

    # Layer 1 linear (bias dropped: cancelled by the BN mean subtraction).
    h1 = jnp.dot(x, w1_ref[...], preferred_element_type=jnp.float32)

    @pl.when(stage == 0)
    def _stats1():
        stats1_ref[...] += jnp.dot(
            vrow, jnp.concatenate([h1, h1 * h1], axis=1),
            preferred_element_type=jnp.float32)

    @pl.when(stage >= 1)
    def _rest():
        # Hoisted per-stage scale/shift: computed once (tile == 0), reused by
        # every batch tile from persistent VMEM scratch.
        @pl.when(jnp.logical_and(stage == 1, tile == 0))
        def _make_ss1():
            s, sh = _bn_scale_shift(stats1_ref[...], bn1_ref[...], inv_n)
            ss1_ref[...] = jnp.concatenate([s, sh], axis=0)

        a1 = jnp.maximum(h1 * ss1_ref[0:1, :] + ss1_ref[1:2, :], 0.0)
        # Layer 2 linear (bias dropped for the same reason).
        h2 = jnp.dot(a1, w2_ref[...], preferred_element_type=jnp.float32)

        @pl.when(stage == 1)
        def _stats2():
            stats2_ref[...] += jnp.dot(
                vrow, jnp.concatenate([h2, h2 * h2], axis=1),
                preferred_element_type=jnp.float32)

        @pl.when(stage == 2)
        def _emit():
            @pl.when(tile == 0)
            def _make_ss2():
                s, sh = _bn_scale_shift(stats2_ref[...], bn2_ref[...], inv_n)
                ss2_ref[...] = jnp.concatenate([s, sh], axis=0)

            a2 = jnp.maximum(h2 * ss2_ref[0:1, :] + ss2_ref[1:2, :], 0.0)
            out = jnp.dot(a2, w3_ref[...], preferred_element_type=jnp.float32)
            o_ref[...] = (out + b3_ref[...]).astype(o_ref.dtype)


def mlp_forward(x, params, *, tile_b=None, force_streaming=False):
    """x: (B, 20) f32 -> (B, 4) f32 (PyTorch MLPmodel training-mode forward)."""
    B, f_in = x.shape
    w1, b1, w2, b2, w3, b3, g1, be1, g2, be2 = params
    del b1, b2   # mathematically dead under training-mode BatchNorm

    h1d, h2d, f_out = w1.shape[1], w2.shape[1], w3.shape[1]

    # Pack per-feature BN params: row 0 = gamma, row 1 = beta.
    bn1 = jnp.concatenate([g1, be1], axis=0)   # (2, 100)
    bn2 = jnp.concatenate([g2, be2], axis=0)   # (2, 50)
    weights = (w1, w2, w3, bn1, bn2, b3)

    # ---------------- resident fast path (activations fit VMEM) --------------
    if not force_streaming and B <= FUSED_MAX_B:
        kernel = functools.partial(_mlp_fused_kernel, inv_n=1.0 / B)
        full2d = lambda a: pl.BlockSpec(a.shape, lambda i: (0, 0))
        return pl.pallas_call(
            kernel,
            out_shape=jax.ShapeDtypeStruct((B, f_out), jnp.float32),
            grid=(1,),
            in_specs=[full2d(x)] + [full2d(a) for a in weights],
            out_specs=pl.BlockSpec((B, f_out), lambda i: (0, 0)),
            compiler_params=pltpu.CompilerParams(
                dimension_semantics=("arbitrary",),
                vmem_limit_bytes=VMEM_LIMIT),
        )(x, *weights)

    # ---------------- streaming path (full-batch BN, batch-tiled) ------------
    if tile_b is None:
        tile_b = DEFAULT_TILE_B
    tile_b = _round_up(max(8, min(tile_b, _round_up(B, 8))), 8)
    b_pad = _round_up(B, tile_b)
    if b_pad != B:
        # Zero rows contribute nothing to layer-1 stats and are explicitly
        # masked out of both stats reductions inside the kernel.
        x = jnp.pad(x, ((0, b_pad - B), (0, 0)))
    n_tiles = b_pad // tile_b

    kernel = functools.partial(_mlp_streaming_kernel,
                               inv_n=1.0 / B, n_valid=B, tile_b=tile_b)
    fullw = lambda a: pl.BlockSpec(a.shape, lambda s, t: (0, 0))

    out = pl.pallas_call(
        kernel,
        out_shape=jax.ShapeDtypeStruct((b_pad, f_out), jnp.float32),
        grid=(3, n_tiles),
        in_specs=[pl.BlockSpec((tile_b, f_in), lambda s, t: (t, 0))]   # x: batch-tiled
                 + [fullw(a) for a in weights],                        # weights resident
        # Output block pinned to block 0 during the stats stages (s // 2 == 0),
        # walks the batch tiles only in the final stage -> one HBM write per tile.
        out_specs=pl.BlockSpec((tile_b, f_out), lambda s, t: (t * (s // 2), 0)),
        scratch_shapes=[
            pltpu.VMEM((1, 2 * h1d), jnp.float32),   # [sum | sum_sq] of h1
            pltpu.VMEM((1, 2 * h2d), jnp.float32),   # [sum | sum_sq] of h2
            pltpu.VMEM((2, h1d), jnp.float32),       # hoisted [scale; shift] BN1
            pltpu.VMEM((2, h2d), jnp.float32),       # hoisted [scale; shift] BN2
        ],
        # Both axes 'arbitrary': every stage reads or carries the BN accumulators,
        # so neither axis may be sharded across TensorCores without a combine.
        compiler_params=pltpu.CompilerParams(
            dimension_semantics=("arbitrary", "arbitrary"),
            vmem_limit_bytes=VMEM_LIMIT),
    )(x, *weights)

    return out[:B]


def init_params(key):
    """Shapes mirror the PyTorch module; Linear weights stored as (in, out)."""
    ks = jax.random.split(key, 3)

    def linear(k, fan_in, fan_out):
        kw, kb = jax.random.split(k)
        bound = 1.0 / jnp.sqrt(fan_in)
        w = jax.random.uniform(kw, (fan_in, fan_out), jnp.float32, -bound, bound)
        b = jax.random.uniform(kb, (1, fan_out), jnp.float32, -bound, bound)
        return w, b

    w1, b1 = linear(ks[0], 20, 100)
    w2, b2 = linear(ks[1], 100, 50)
    w3, b3 = linear(ks[2], 50, 4)
    # BatchNorm affine params (PyTorch default: weight=1, bias=0)
    g1, be1 = jnp.ones((1, 100), jnp.float32), jnp.zeros((1, 100), jnp.float32)
    g2, be2 = jnp.ones((1, 50), jnp.float32), jnp.zeros((1, 50), jnp.float32)
    return (w1, b1, w2, b2, w3, b3, g1, be1, g2, be2)


def mlp_reference(x, params):
    """Pure-JAX reference of the PyTorch training-mode forward (biases included)."""
    w1, b1, w2, b2, w3, b3, g1, be1, g2, be2 = params

    def bn_relu(h, g, be):
        m = jnp.mean(h, axis=0, keepdims=True)
        v = jnp.mean((h - m) ** 2, axis=0, keepdims=True)
        return jnp.maximum((h - m) / jnp.sqrt(v + EPS) * g + be, 0.0)

    h = bn_relu(x @ w1 + b1, g1, be1)
    h = bn_relu(h @ w2 + b2, g2, be2)
    return h @ w3 + b3


if __name__ == "__main__":
    key = jax.random.PRNGKey(0)
    kx, kx2, kp = jax.random.split(key, 3)
    params = init_params(kp)

    # 1) Resident fast path: small batch (>1 required for training-mode BN).
    B1 = 8
    x1 = jax.random.normal(kx, (B1, 20), jnp.float32)
    out1 = jax.block_until_ready(mlp_forward(x1, params))
    ref1 = mlp_reference(x1, params)
    assert out1.shape == (B1, 4)
    assert jnp.allclose(out1, ref1, atol=1e-3, rtol=1e-3), "fast path mismatch"

    # 2) Streaming path with a non-tile-multiple batch (exercises padding+mask).
    B2 = 200
    x2 = jax.random.normal(kx2, (B2, 20), jnp.float32)
    out2 = jax.block_until_ready(
        mlp_forward(x2, params, tile_b=64, force_streaming=True))
    ref2 = mlp_reference(x2, params)
    assert out2.shape == (B2, 4)
    assert jnp.allclose(out2, ref2, atol=1e-3, rtol=1e-3), "streaming path mismatch"

    print("KERNEL_OK")
</pallas_src>

<mosaic_0001>
module attributes {stable_mosaic.version = 11 : i64} {
  func.func @_mlp_fused_kernel(%arg0: i32, %arg1: memref<8x20xf32, #tpu.memory_space<vmem>>, %arg2: memref<20x100xf32, #tpu.memory_space<vmem>>, %arg3: memref<100x50xf32, #tpu.memory_space<vmem>>, %arg4: memref<50x4xf32, #tpu.memory_space<vmem>>, %arg5: memref<2x100xf32, #tpu.memory_space<vmem>>, %arg6: memref<2x50xf32, #tpu.memory_space<vmem>>, %arg7: memref<1x4xf32, #tpu.memory_space<vmem>>, %arg8: memref<8x4xf32, #tpu.memory_space<vmem>>) attributes {dimension_semantics = [#tpu.dimension_semantics<arbitrary>], iteration_bounds = array<i64: 1>, scalar_prefetch = 0 : i64, scratch_operands = 0 : i64, tpu.core_type = #tpu.core_type<tc>, window_params = [{pipeline_mode = #tpu.pipeline_mode<synchronous>, transform_indices = @transform_0, window_bounds = array<i64: 8, 20>}, {pipeline_mode = #tpu.pipeline_mode<synchronous>, transform_indices = @transform_1, window_bounds = array<i64: 20, 100>}, {pipeline_mode = #tpu.pipeline_mode<synchronous>, transform_indices = @transform_2, window_bounds = array<i64: 100, 50>}, {pipeline_mode = #tpu.pipeline_mode<synchronous>, transform_indices = @transform_3, window_bounds = array<i64: 50, 4>}, {pipeline_mode = #tpu.pipeline_mode<synchronous>, transform_indices = @transform_4, window_bounds = array<i64: 2, 100>}, {pipeline_mode = #tpu.pipeline_mode<synchronous>, transform_indices = @transform_5, window_bounds = array<i64: 2, 50>}, {pipeline_mode = #tpu.pipeline_mode<synchronous>, transform_indices = @transform_6, window_bounds = array<i64: 1, 4>}, {pipeline_mode = #tpu.pipeline_mode<synchronous>, transform_indices = @transform_7, window_bounds = array<i64: 8, 4>}]} {
    %c0 = arith.constant 0 : index
    %c0_0 = arith.constant 0 : index
    %0 = vector.load %arg1[%c0, %c0_0] : memref<8x20xf32, #tpu.memory_space<vmem>>, vector<8x20xf32>
    %cst = arith.constant 1.000000e+00 : f32
    %1 = vector.broadcast %cst : f32 to vector<1x8xf32>
    %c0_1 = arith.constant 0 : index
    %c0_2 = arith.constant 0 : index
    %2 = vector.load %arg2[%c0_1, %c0_2] : memref<20x100xf32, #tpu.memory_space<vmem>>, vector<20x100xf32>
    %cst_3 = arith.constant dense<0.000000e+00> : vector<8x100xf32>
    %3 = tpu.matmul %0, %2, %cst_3 {dimension_numbers = #tpu.dot_dimension_numbers<[1], [0], [0], [1], [0, 0, 1, 1], [], []>} : vector<8x20xf32>, vector<20x100xf32>, vector<8x100xf32> -> vector<8x100xf32>
    %4 = arith.mulf %3, %3 : vector<8x100xf32>
    %5 = tpu.concatenate %3, %4 in 1 : vector<8x100xf32>, vector<8x100xf32> -> vector<8x200xf32>
    %cst_4 = arith.constant dense<0.000000e+00> : vector<1x200xf32>
    %6 = tpu.matmul %1, %5, %cst_4 {dimension_numbers = #tpu.dot_dimension_numbers<[1], [0], [0], [1], [0, 0, 1, 1], [], []>} : vector<1x8xf32>, vector<8x200xf32>, vector<1x200xf32> -> vector<1x200xf32>
    %c0_5 = arith.constant 0 : index
    %c0_6 = arith.constant 0 : index
    %7 = vector.load %arg5[%c0_5, %c0_6] : memref<2x100xf32, #tpu.memory_space<vmem>>, vector<2x100xf32>
    %8 = vector.extract_strided_slice %6 {offsets = [0, 0], sizes = [1, 100], strides = [1, 1]} : vector<1x200xf32> to vector<1x100xf32>
    %cst_7 = arith.constant 1.250000e-01 : f32
    %9 = vector.broadcast %cst_7 : f32 to vector<1x100xf32>
    %10 = arith.mulf %8, %9 : vector<1x100xf32>
    %11 = vector.extract_strided_slice %6 {offsets = [0, 100], sizes = [1, 100], strides = [1, 1]} : vector<1x200xf32> to vector<1x100xf32>
    %cst_8 = arith.constant 1.250000e-01 : f32
    %12 = vector.broadcast %cst_8 : f32 to vector<1x100xf32>
    %13 = arith.mulf %11, %12 : vector<1x100xf32>
    %14 = arith.mulf %10, %10 : vector<1x100xf32>
    %15 = arith.subf %13, %14 : vector<1x100xf32>
    %16 = vector.extract_strided_slice %7 {offsets = [0, 0], sizes = [1, 100], strides = [1, 1]} : vector<2x100xf32> to vector<1x100xf32>
    %cst_9 = arith.constant 9.99999974E-6 : f32
    %17 = vector.broadcast %cst_9 : f32 to vector<1x100xf32>
    %18 = arith.addf %15, %17 : vector<1x100xf32>
    %19 = math.rsqrt %18 : vector<1x100xf32>
    %20 = arith.mulf %16, %19 : vector<1x100xf32>
    %21 = vector.extract_strided_slice %7 {offsets = [1, 0], sizes = [1, 100], strides = [1, 1]} : vector<2x100xf32> to vector<1x100xf32>
    %22 = arith.mulf %10, %20 : vector<1x100xf32>
    %23 = arith.subf %21, %22 : vector<1x100xf32>
    %24 = vector.broadcast %20 : vector<1x100xf32> to vector<8x100xf32>
    %25 = arith.mulf %3, %24 : vector<8x100xf32>
    %26 = vector.broadcast %23 : vector<1x100xf32> to vector<8x100xf32>
    %27 = arith.addf %25, %26 : vector<8x100xf32>
    %cst_10 = arith.constant 0.000000e+00 : f32
    %28 = vector.broadcast %cst_10 : f32 to vector<8x100xf32>
    %29 = arith.maximumf %27, %28 : vector<8x100xf32>
    %c0_11 = arith.constant 0 : index
    %c0_12 = arith.constant 0 : index
    %30 = vector.load %arg3[%c0_11, %c0_12] : memref<100x50xf32, #tpu.memory_space<vmem>>, vector<100x50xf32>
    %cst_13 = arith.constant dense<0.000000e+00> : vector<8x50xf32>
    %31 = tpu.matmul %29, %30, %cst_13 {dimension_numbers = #tpu.dot_dimension_numbers<[1], [0], [0], [1], [0, 0, 1, 1], [], []>} : vector<8x100xf32>, vector<100x50xf32>, vector<8x50xf32> -> vector<8x50xf32>
    %32 = arith.mulf %31, %31 : vector<8x50xf32>
    %33 = tpu.concatenate %31, %32 in 1 : vector<8x50xf32>, vector<8x50xf32> -> vector<8x100xf32>
    %cst_14 = arith.constant dense<0.000000e+00> : vector<1x100xf32>
    %34 = tpu.matmul %1, %33, %cst_14 {dimension_numbers = #tpu.dot_dimension_numbers<[1], [0], [0], [1], [0, 0, 1, 1], [], []>} : vector<1x8xf32>, vector<8x100xf32>, vector<1x100xf32> -> vector<1x100xf32>
    %c0_15 = arith.constant 0 : index
    %c0_16 = arith.constant 0 : index
    %35 = vector.load %arg6[%c0_15, %c0_16] : memref<2x50xf32, #tpu.memory_space<vmem>>, vector<2x50xf32>
    %36 = vector.extract_strided_slice %34 {offsets = [0, 0], sizes = [1, 50], strides = [1, 1]} : vector<1x100xf32> to vector<1x50xf32>
    %cst_17 = arith.constant 1.250000e-01 : f32
    %37 = vector.broadcast %cst_17 : f32 to vector<1x50xf32>
    %38 = arith.mulf %36, %37 : vector<1x50xf32>
    %39 = vector.extract_strided_slice %34 {offsets = [0, 50], sizes = [1, 50], strides = [1, 1]} : vector<1x100xf32> to vector<1x50xf32>
    %cst_18 = arith.constant 1.250000e-01 : f32
    %40 = vector.broadcast %cst_18 : f32 to vector<1x50xf32>
    %41 = arith.mulf %39, %40 : vector<1x50xf32>
    %42 = arith.mulf %38, %38 : vector<1x50xf32>
    %43 = arith.subf %41, %42 : vector<1x50xf32>
    %44 = vector.extract_strided_slice %35 {offsets = [0, 0], sizes = [1, 50], strides = [1, 1]} : vector<2x50xf32> to vector<1x50xf32>
    %cst_19 = arith.constant 9.99999974E-6 : f32
    %45 = vector.broadcast %cst_19 : f32 to vector<1x50xf32>
    %46 = arith.addf %43, %45 : vector<1x50xf32>
    %47 = math.rsqrt %46 : vector<1x50xf32>
    %48 = arith.mulf %44, %47 : vector<1x50xf32>
    %49 = vector.extract_strided_slice %35 {offsets = [1, 0], sizes = [1, 50], strides = [1, 1]} : vector<2x50xf32> to vector<1x50xf32>
    %50 = arith.mulf %38, %48 : vector<1x50xf32>
    %51 = arith.subf %49, %50 : vector<1x50xf32>
    %52 = vector.broadcast %48 : vector<1x50xf32> to vector<8x50xf32>
    %53 = arith.mulf %31, %52 : vector<8x50xf32>
    %54 = vector.broadcast %51 : vector<1x50xf32> to vector<8x50xf32>
    %55 = arith.addf %53, %54 : vector<8x50xf32>
    %cst_20 = arith.constant 0.000000e+00 : f32
    %56 = vector.broadcast %cst_20 : f32 to vector<8x50xf32>
    %57 = arith.maximumf %55, %56 : vector<8x50xf32>
    %c0_21 = arith.constant 0 : index
    %c0_22 = arith.constant 0 : index
    %58 = vector.load %arg4[%c0_21, %c0_22] : memref<50x4xf32, #tpu.memory_space<vmem>>, vector<50x4xf32>
    %cst_23 = arith.constant dense<0.000000e+00> : vector<8x4xf32>
    %59 = tpu.matmul %57, %58, %cst_23 {dimension_numbers = #tpu.dot_dimension_numbers<[1], [0], [0], [1], [0, 0, 1, 1], [], []>} : vector<8x50xf32>, vector<50x4xf32>, vector<8x4xf32> -> vector<8x4xf32>
    %c0_24 = arith.constant 0 : index
    %c0_25 = arith.constant 0 : index
    %60 = vector.load %arg7[%c0_24, %c0_25] : memref<1x4xf32, #tpu.memory_space<vmem>>, vector<1x4xf32>
    %61 = vector.broadcast %60 : vector<1x4xf32> to vector<8x4xf32>
    %62 = arith.addf %59, %61 : vector<8x4xf32>
    %c0_26 = arith.constant 0 : index
    %c0_27 = arith.constant 0 : index
    %63 = vector.load %arg8[%c0_26, %c0_27] : memref<8x4xf32, #tpu.memory_space<vmem>>, vector<8x4xf32>
    tpu.vector_store %arg8[%c0_26, %c0_27], %62 {strides = array<i32>} : memref<8x4xf32, #tpu.memory_space<vmem>>, vector<8x4xf32>,
    return
  }
  func.func @transform_0(%arg0: i32) -> (i32, i32) {
    %c0_i32 = arith.constant 0 : i32
    %c0_i32_0 = arith.constant 0 : i32
    %c0_i32_1 = arith.constant 0 : i32
    return %c0_i32, %c0_i32_0 : i32, i32
  }
  func.func @transform_1(%arg0: i32) -> (i32, i32) {
    %c0_i32 = arith.constant 0 : i32
    %c0_i32_0 = arith.constant 0 : i32
    %c0_i32_1 = arith.constant 0 : i32
    return %c0_i32, %c0_i32_0 : i32, i32
  }
  func.func @transform_2(%arg0: i32) -> (i32, i32) {
    %c0_i32 = arith.constant 0 : i32
    %c0_i32_0 = arith.constant 0 : i32
    %c0_i32_1 = arith.constant 0 : i32
    return %c0_i32, %c0_i32_0 : i32, i32
  }
  func.func @transform_3(%arg0: i32) -> (i32, i32) {
    %c0_i32 = arith.constant 0 : i32
    %c0_i32_0 = arith.constant 0 : i32
    %c0_i32_1 = arith.constant 0 : i32
    return %c0_i32, %c0_i32_0 : i32, i32
  }
  func.func @transform_4(%arg0: i32) -> (i32, i32) {
    %c0_i32 = arith.constant 0 : i32
    %c0_i32_0 = arith.constant 0 : i32
    %c0_i32_1 = arith.constant 0 : i32
    return %c0_i32, %c0_i32_0 : i32, i32
  }
  func.func @transform_5(%arg0: i32) -> (i32, i32) {
    %c0_i32 = arith.constant 0 : i32
    %c0_i32_0 = arith.constant 0 : i32
    %c0_i32_1 = arith.constant 0 : i32
    return %c0_i32, %c0_i32_0 : i32, i32
  }
  func.func @transform_6(%arg0: i32) -> (i32, i32) {
    %c0_i32 = arith.constant 0 : i32
    %c0_i32_0 = arith.constant 0 : i32
    %c0_i32_1 = arith.constant 0 : i32
    return %c0_i32, %c0_i32_0 : i32, i32
  }
  func.func @transform_7(%arg0: i32) -> (i32, i32) {
    %c0_i32 = arith.constant 0 : i32
    %c0_i32_0 = arith.constant 0 : i32
    %c0_i32_1 = arith.constant 0 : i32
    return %c0_i32, %c0_i32_0 : i32, i32
  }
}

</mosaic_0001>

<bundles_post_ra>
// kernel: tpu_custom_call.1
= control target key start
LH: loop header
LB: loop body
LE: loop exit
PB: predicated region body
PF: predicated region fallthrough
CT: control target
= control target key end

     0   :  { %vm34_vm0 = vcmask 1043456   ;;  %vm30_vm1 = vcmask 162816   ;;  %s326_s9 = smov 100   ;;  %vm63_vm2 = vcmask 818176   ;;  %vm65_vm3 = vcmask 64512   ;;  %s328_s10 = smov 28   ;;  %s479_s1 = inlined_call_operand.vmem [shape: f32[20,100], index: 1, kind: input, shape index: {}]   ;;  %s480_s0 = inlined_call_operand.vmem [shape: f32[8,20], index: 0, kind: input, shape index: {}]   ;;  %s481_s2 = inlined_call_operand.vmem [shape: f32[100,50], index: 2, kind: input, shape index: {}]   ;;  %s482_s4 = inlined_call_operand.vmem [shape: f32[2,100], index: 4, kind: input, shape index: {}]   ;;  %s483_s6 = inlined_call_operand.vmem [shape: f32[1,4], index: 6, kind: input, shape index: {}]   ;;  %s484_s3 = inlined_call_operand.vmem [shape: f32[50,4], index: 3, kind: input, shape index: {}]   ;;  %s485_s5 = inlined_call_operand.vmem [shape: f32[2,50], index: 5, kind: input, shape index: {}]   ;;  %s486_s7 = inlined_call_operand.vmem [shape: f32[8,4], index: 7, kind: output, shape index: {}]  }
   0x1   :  { %v29_v0 = vld [vmem:[%s479_s1 + $0x10] sm:$0xf]  ;;  %v28_v1 = vld [vmem:[%s479_s1 + $0x8] sm:$0xff]  ;;  %v27_v2 = vld [vmem:[%s479_s1] sm:$0xff]  ;;  %v327_v8 = vmov 1.0   ;;  %vm147_vm10 = vcmask 228352  }
   0x2   :  { %305 = vmatpush.msk.msra.mxu0 %vm34_vm0, %v29_v0  ;;  %v26_v3 = vld [vmem:[%s480_s0] sm:$0xff]  ;;  %v172_v34 = vld [vmem:[%s481_s2 + $0x58] sm:$0xff]  ;;  %v171_v35 = vld [vmem:[%s481_s2 + $0x50] sm:$0xff]  ;;  %vm205_vm11 = vcmask 408576   ;;  %vm275_vm15 = vcmask 1041408  }
   0x3   :  { %v173_v14 = vld [vmem:[%s481_s2 + $0x60] sm:$0xf]  ;;  %v170_v36 = vld [vmem:[%s481_s2 + $0x48] sm:$0xff]  ;;  %v168_v38 = vld [vmem:[%s481_s2 + $0x38] sm:$0xff] }
   0x4   :  { %52 = vmatpush.msra.mxu0 %v28_v1  ;;  %309 = vmatpush.msk.msra.mxu3 %vm34_vm0, %v173_v14  ;;  %v169_v37 = vld [vmem:[%s481_s2 + $0x40] sm:$0xff]  ;;  %v167_v39 = vld [vmem:[%s481_s2 + $0x30] sm:$0xff]  ;;  %v166_v40 = vld [vmem:[%s481_s2 + $0x28] sm:$0xff]  ;;  %vm299_vm0 = vcmask 31744  }
   0x5   :  { %v165_v41 = vld [vmem:[%s481_s2 + $0x20] sm:$0xff]  ;;  %v164_v42 = vld [vmem:[%s481_s2 + $0x18] sm:$0xff]  ;;  %v163_v43 = vld [vmem:[%s481_s2 + $0x10] sm:$0xff] }
   0x6   :  { %53 = vmatpush.msra.mxu0 %v27_v2  ;;  %184 = vmatpush.msra.mxu3 %v172_v34  ;;  %v162_v44 = vld [vmem:[%s481_s2 + $0x8] sm:$0xff]  ;;  %v161_v45 = vld [vmem:[%s481_s2] sm:$0xff]  ;;  %s329_s2 = smov 50  }
   0x7   :  { %306 = vmatmul.msk.f32.vlgmr.msra.gmra.mxu0 %vm30_vm1, %v26_v3  ;;  %v109_v47 = vld [vmem:[%s482_s4] sm:$0x3]  ;;  %s330_s4 = smov 78  }
   0x8   :  { %185 = vmatpush.msra.mxu3 %v171_v35  ;;  %v265_v14 = vld [vmem:[%s484_s3 + $0x20] sm:$0xff] }
   0xa   :  { %186 = vmatpush.msra.mxu3 %v170_v36 }
   0xc   :  { %187 = vmatpush.msra.mxu3 %v169_v37 }
   0xe   :  { %188 = vmatpush.msra.mxu3 %v168_v38 }
  0x10   :  { %189 = vmatpush.msra.mxu3 %v167_v39 }
  0x12   :  { %190 = vmatpush.msra.mxu3 %v166_v40 }
  0x14   :  { %191 = vmatpush.msra.mxu3 %v165_v41 }
  0x16   :  { %192 = vmatpush.msra.mxu3 %v164_v42 }
  0x18   :  { %193 = vmatpush.msra.mxu3 %v163_v43 }
  0x1a   :  { %194 = vmatpush.msra.mxu3 %v162_v44 }
  0x1c   :  { %195 = vmatpush.msra.mxu3 %v161_v45 }
  0x84   :  { %v384_v4 = vpop.f32.mrf.mxu0 }
  0x85   :  { %v58_v5 = vmul.f32 %v384_v4, %v384_v4 }
  0x87   :  { %60 = vrot.lane.b32.xlu0 %v58_v5, %s326_s9 }
  0xf9   :  { %v61_v6 = vpop.permute.xlu0 %60 }
  0xfa   :  { %104 = vmatpush.msra.mxu2 %v61_v6  ;;  %v64_v7 = vsel %vm63_vm2, %v384_v4, %v61_v6 }
  0xfb   :  { %84 = vmatpush.msra.mxu1 %v64_v7  ;;  %308 = vmatmul.msk.f32.vlgmr.msra.gmra.mxu2 %vm65_vm3, %v327_v8 }
  0xfc   :  { %307 = vmatmul.msk.f32.vlgmr.msra.gmra.mxu1 %vm65_vm3, %v327_v8 }
 0x179   :  { %v86_v9 = vpop.f32.mrf.mxu1 }
 0x17a   :  { %v394_v10 = vmul.f32 0.125, %v86_v9 }
 0x17c   :  { %v112_v11 = vmul.f32 %v394_v10, %v394_v10 }
 0x17e   :  { %114 = vrot.lane.b32.xlu0 %v112_v11, %s326_s9  ;;  %v106_v12 = vpop.f32.mrf.mxu2 }
 0x17f   :  { %v111_v13 = vmul.f32 0.125, %v106_v12 }
 0x1f0   :  { %v115_v15 = vpop.permute.xlu0 %114 }
 0x1f1   :  { %v117_v16 = vsub.f32 %v394_v10, %v115_v15  ;;  %v118_v17 = vsub.f32 %v111_v13, %v115_v15  ;;  %v266_v13 = vld [vmem:[%s484_s3 + $0x28] sm:$0xff]  ;;  %v264_v15 = vld [vmem:[%s484_s3 + $0x18] sm:$0xff] }
 0x1f3   :  { %v119_v18 = vadd.f32 1e-05, %v117_v16  ;;  %v120_v19 = vadd.f32 1e-05, %v118_v17  ;;  %v263_v16 = vld [vmem:[%s484_s3 + $0x10] sm:$0xff]  ;;  %v262_v17 = vld [vmem:[%s484_s3 + $0x8] sm:$0xff] }
 0x1f5   :  { %320 = vrsqrt.f32 %v119_v18  ;;  %vm127_vm5 = vweird.f32 %v119_v18  ;;  %vm137_vm8 = vweird.f32 %v120_v19 }
 0x1f6   :  { %322 = vrsqrt.f32 %v120_v19 }
 0x1fb   :  { %v321_v20 = vpop.eup %320 }
 0x1fc   :  { %v323_v21 = vpop.eup %322  ;;  %v122_v22 = vmul.f32 %v321_v20, %v119_v18  ;;  %vm128_vm4 = vweird.f32 %v321_v20  ;;  %v261_v18 = vld [vmem:[%s484_s3] sm:$0xff] }
 0x1fd   :  { %v132_v23 = vmul.f32 %v323_v21, %v120_v19  ;;  %vm129_vm6 = vmor %vm127_vm5, %vm128_vm4  ;;  %vm138_vm7 = vweird.f32 %v323_v21  ;;  %v227_v19 = vld [vmem:[%s485_s5] sm:$0x3] }
 0x1fe   :  { %v123_v24 = vmul.f32 %v321_v20, %v122_v22  ;;  %vm139_vm9 = vmor %vm137_vm8, %vm138_vm7 }
 0x1ff   :  { %v133_v25 = vmul.f32 %v323_v21, %v132_v23 }
 0x200   :  { %v124_v26 = vmul.f32 0.5, %v123_v24 }
 0x201   :  { %v134_v28 = vmul.f32 0.5, %v133_v25 }
 0x202   :  { %v125_v27 = vsub.f32 1.5, %v124_v26 }
 0x203   :  { %v135_v31 = vsub.f32 1.5, %v134_v28 }
 0x204   :  { %v126_v29 = vmul.f32 %v321_v20, %v125_v27 }
 0x205   :  { %v136_v32 = vmul.f32 %v323_v21, %v135_v31 }
 0x206   :  { %v130_v30 = vsel %vm129_vm6, %v321_v20, %v126_v29 }
 0x207   :  { %143 = vrot.lane.b32.xlu1 %v130_v30, %s328_s10  ;;  %v140_v33 = vsel %vm139_vm9, %v323_v21, %v136_v32  ;;  %v319_v30 = vld [vmem:[%s483_s6] ss:$0 sm:$0xff] }
 0x20f   :  { %145 = vrot.lane.b32.xlu1 %v140_v33, %s328_s10 }
 0x279   :  { %v144_v46 = vpop.permute.xlu1 %143 }
 0x281   :  { %v146_v48 = vpop.permute.xlu1 %145 }
 0x282   :  { %v148_v49 = vsel %vm147_vm10, %v144_v46, %v146_v48 }
 0x283   :  { %v150_v50 = vmul.f32 %v148_v49, %v109_v47 }
 0x285   :  { %v151_v51 = vmul.f32 %v150_v50, %v394_v10  ;;  %v156_v53 = vperm.slane %v150_v50, 0 }
 0x287   :  { %v153_v52 = vrot.slane %v151_v51, 7  ;;  %v157_v56 = vmul.f32 %v156_v53, %v384_v4 }
 0x289   :  { %v155_v54 = vsub.f32 %v109_v47, %v153_v52 }
 0x28b   :  { %v158_v55 = vperm.slane %v155_v54, 1 }
 0x28d   :  { %v159_v57 = vadd.f32 %v158_v55, %v157_v56 }
 0x28f   :  { %v160_v58 = vmax.f32 %v159_v57, 0.0 }
 0x291   :  { %310 = vmatmul.msk.f32.vlgmr.msra.gmra.mxu3 %vm63_vm2, %v160_v58 }
 0x314   :  { %v197_v59 = vpop.f32.mrf.mxu3 }
 0x315   :  { %v200_v60 = vmul.f32 %v197_v59, %v197_v59 }
 0x317   :  { %202 = vrot.lane.b32.xlu2 %v200_v60, %s329_s2 }
 0x371   :  { %v203_v61 = vpop.permute.xlu2 %202 }
 0x372   :  { %v206_v62 = vsel %vm205_vm11, %v197_v59, %v203_v61 }
 0x373   :  { %222 = vmatpush.msrb.mxu1 %v206_v62 }
 0x374   :  { %311 = vmatmul.msk.f32.vlgmr.msrb.gmra.mxu1 %vm65_vm3, %v327_v8  ;;  %v267_v8 = vld [vmem:[%s484_s3 + $0x30] sm:$0x3] }
 0x375   :  { %312 = vmatpush.msk.msrb.mxu2 %vm275_vm15, %v267_v8 }
 0x377   :  { %289 = vmatpush.msrb.mxu2 %v266_v13 }
 0x379   :  { %290 = vmatpush.msrb.mxu2 %v265_v14 }
 0x37b   :  { %291 = vmatpush.msrb.mxu2 %v264_v15 }
 0x37d   :  { %292 = vmatpush.msrb.mxu2 %v263_v16 }
 0x37f   :  { %293 = vmatpush.msrb.mxu2 %v262_v17 }
 0x381   :  { %294 = vmatpush.msrb.mxu2 %v261_v18 }
 0x3f1   :  { %v224_v63 = vpop.f32.mrf.mxu1 }
 0x3f2   :  { %v228_v0 = vmul.f32 0.125, %v224_v63 }
 0x3f4   :  { %v229_v1 = vmul.f32 %v228_v0, %v228_v0 }
 0x3f6   :  { %231 = vrot.lane.b32.xlu2 %v229_v1, %s329_s2 }
 0x450   :  { %v232_v2 = vpop.permute.xlu2 %231 }
 0x451   :  { %v234_v3 = vsub.f32 %v228_v0, %v232_v2 }
 0x453   :  { %v235_v4 = vadd.f32 1e-05, %v234_v3 }
 0x455   :  { %324 = vrsqrt.f32 %v235_v4  ;;  %vm242_vm13 = vweird.f32 %v235_v4 }
 0x45b   :  { %v325_v5 = vpop.eup %324 }
 0x45c   :  { %v237_v6 = vmul.f32 %v325_v5, %v235_v4  ;;  %vm243_vm12 = vweird.f32 %v325_v5 }
 0x45d   :  { %vm244_vm14 = vmor %vm242_vm13, %vm243_vm12 }
 0x45e   :  { %v238_v7 = vmul.f32 %v325_v5, %v237_v6 }
 0x460   :  { %v239_v9 = vmul.f32 0.5, %v238_v7 }
 0x462   :  { %v240_v10 = vsub.f32 1.5, %v239_v9 }
 0x464   :  { %v241_v11 = vmul.f32 %v325_v5, %v240_v10 }
 0x466   :  { %v245_v12 = vsel %vm244_vm14, %v325_v5, %v241_v11 }
 0x467   :  { %247 = vrot.lane.b32.xlu0 %v245_v12, %s330_s4 }
 0x4d9   :  { %v248_v20 = vpop.permute.xlu0 %247 }
 0x4da   :  { %v250_v21 = vmul.f32 %v248_v20, %v227_v19 }
 0x4dc   :  { %v251_v22 = vmul.f32 %v250_v21, %v228_v0  ;;  %v256_v24 = vperm.slane %v250_v21, 0 }
 0x4de   :  { %v253_v23 = vrot.slane %v251_v22, 7  ;;  %v257_v26 = vmul.f32 %v256_v24, %v197_v59 }
 0x4e0   :  { %v255_v25 = vsub.f32 %v227_v19, %v253_v23 }
 0x4e2   :  { %v258_v27 = vperm.slane %v255_v25, 1 }
 0x4e4   :  { %v259_v28 = vadd.f32 %v258_v27, %v257_v26 }
 0x4e6   :  { %v260_v29 = vmax.f32 %v259_v28, 0.0 }
 0x4e8   :  { %313 = vmatmul.msk.f32.vlgmr.msrb.gmra.mxu2 %vm205_vm11, %v260_v29 }
 0x56b   :  { %v296_v31 = vpop.f32.mrf.mxu2 }
 0x56c   :  { %v297_v32 = vadd.f32 %v319_v30, %v296_v31 }
 0x56e   :  { %300 = vst.msk [vmem:[%s486_s7] sm:$0xff] %vm299_vm0, %v297_v32 }

</bundles_post_ra>
